<compile_context>
chip_gen: v5e
topology: v5e:2x2
jax: 0.10.0
libtpu: 0.0.40
codegen_flags: <defaults>
</compile_context>

<pallas_src>
import functools

import jax
import jax.numpy as jnp
from jax import lax
from jax.experimental import pallas as pl
from jax.experimental.pallas import tpu as pltpu


def _layernorm_kernel(x_ref, w_ref, b_ref, o_ref, *, eps: float, n_state: int):
    # x_ref: (tile_rows, n_state) block in VMEM.  All math in f32.
    x = x_ref[...].astype(jnp.float32)
    inv_n = jnp.float32(1.0 / n_state)

    # Two-pass statistics (matches the PyTorch module: mean, then
    # sum((x - mean)^2)/n).  The reduces run on the XLU, rsqrt on the EUP.
    mean = jnp.sum(x, axis=-1, keepdims=True) * inv_n
    d = x - mean
    var = jnp.sum(d * d, axis=-1, keepdims=True) * inv_n
    inv = lax.rsqrt(var + eps)

    w = w_ref[...].astype(jnp.float32)   # (1, n_state)
    b = b_ref[...].astype(jnp.float32)
    o_ref[...] = (d * inv * w + b).astype(o_ref.dtype)


def _round_up(x: int, m: int) -> int:
    return (x + m - 1) // m * m


def _vmem_capacity_bytes() -> int:
    """Per-core VMEM capacity; conservative default if the query fails."""
    try:
        info = pltpu.get_tpu_info()
        cap = int(getattr(info, "vmem_capacity_bytes", 0))
        if cap > 0:
            return cap
    except Exception:
        pass
    return 64 * 1024 * 1024   # v7x per-TensorCore VMEM (smallest current part)


def _layernorm_jnp(x2: jax.Array, weight: jax.Array, bias: jax.Array,
                   eps: float) -> jax.Array:
    """Plain-JAX fallback for tiny row counts (dispatch/step overhead dominates)."""
    xf = x2.astype(jnp.float32)
    mean = jnp.mean(xf, axis=-1, keepdims=True)
    d = xf - mean
    var = jnp.mean(d * d, axis=-1, keepdims=True)
    out = d * lax.rsqrt(var + eps) * weight.astype(jnp.float32) + bias.astype(jnp.float32)
    return out.astype(x2.dtype)


def layer_norm(x: jax.Array, weight: jax.Array, bias: jax.Array,
               eps: float = 1e-5,
               tile_rows: int | None = None,
               vmem_budget_bytes: int = 12 * 1024 * 1024) -> jax.Array:
    """LayerNorm over the last axis of x (…, n_state), matching the PyTorch module."""
    orig_shape = x.shape
    n_state = orig_shape[-1]
    assert weight.shape == (n_state,) and bias.shape == (n_state,)

    x2 = x.reshape(-1, n_state)
    rows = x2.shape[0]

    itemsize = jnp.dtype(x.dtype).itemsize
    # Sublane quantum: 8 rows for 4-byte dtypes, 16 for 2-byte, 32 for 1-byte.
    row_quantum = {1: 32, 2: 16}.get(itemsize, 8)

    # Small-problem fallback (e.g. single-token decode): skip the kernel.
    if rows < 4 * row_quantum:
        return _layernorm_jnp(x2, weight, bias, eps).reshape(orig_shape)

    rows_q = _round_up(rows, row_quantum)

    # --- Tile sizing -------------------------------------------------------
    # Per-row VMEM per grid step: double-buffered in + out tiles
    # (2 arrays * 2 buffers) plus ~3 tile-sized f32 temporaries during compute.
    per_row_bytes = 4 * n_state * itemsize + 3 * n_state * 4
    if tile_rows is None:
        tr = max(row_quantum, min(vmem_budget_bytes // per_row_bytes, 1024))
        tr = min(_round_up(tr, row_quantum), rows_q)
        # Target >= 8 grid steps (>= 4 per core when the "parallel" axis is
        # sharded across v7x's 2 TensorCores) so prefetch/writeback overlaps
        # compute — but never shrink tiles below ~256 rows (streaming ops are
        # already near the HBM roofline there).
        target_steps = 8
        if pl.cdiv(rows, tr) < target_steps:
            min_tr = min(tr, max(row_quantum, 256))
            tr = max(min_tr, _round_up(pl.cdiv(rows, target_steps), row_quantum))
    else:
        tr = min(_round_up(max(row_quantum, int(tile_rows)), row_quantum), rows_q)

    grid = pl.cdiv(rows, tr)   # ragged last block handled by Pallas masking

    # --- Scoped-VMEM limit: actual need + headroom, generation-aware cap ----
    vmem_cap = _vmem_capacity_bytes()
    cap = min((3 * vmem_cap) // 4, vmem_cap - (16 << 20))   # ~48 MiB on 64 MiB parts
    db_bytes = 4 * tr * n_state * itemsize                  # double-buffered in/out tiles
    f32_bytes = 4 * tr * n_state * 4                        # f32 working set (generous)
    need = db_bytes + f32_bytes + (2 << 20)                 # + Mosaic internal scratch
    vmem_limit = int(min(cap, max(need, 16 << 20)))

    # NOTE: if n_state % 128 != 0 the output stores are lane-masked (slower but
    # correct); padding the feature axis would change the statistics, so we
    # deliberately do not do it here.
    w2 = weight.reshape(1, n_state)
    b2 = bias.reshape(1, n_state)

    kernel = functools.partial(_layernorm_kernel, eps=eps, n_state=n_state)

    out2 = pl.pallas_call(
        kernel,
        out_shape=jax.ShapeDtypeStruct((rows, n_state), x.dtype),
        grid_spec=pltpu.PrefetchScalarGridSpec(
            num_scalar_prefetch=0,
            grid=(grid,),
            in_specs=[
                pl.BlockSpec((tr, n_state), lambda i: (i, 0)),
                pl.BlockSpec((1, n_state), lambda i: (0, 0)),
                pl.BlockSpec((1, n_state), lambda i: (0, 0)),
            ],
            out_specs=pl.BlockSpec((tr, n_state), lambda i: (i, 0)),
        ),
        compiler_params=pltpu.CompilerParams(
            dimension_semantics=("parallel",),
            vmem_limit_bytes=vmem_limit,
        ),
    )(x2, w2, b2)

    return out2.reshape(orig_shape)


def _reference(x, weight, bias, eps):
    n_state = x.shape[-1]
    mean = jnp.mean(x, axis=-1, keepdims=True)
    var = jnp.sum((x - mean) ** 2, axis=-1, keepdims=True) / n_state
    return (x - mean) / jnp.sqrt(var + eps) * weight + bias


if __name__ == "__main__":
    key = jax.random.PRNGKey(0)
    k1, k2, k3, k4, k5 = jax.random.split(key, 5)

    n_state = 128   # lane-dense output (multiple of 128)

    # Case 1: module-style init (weight=1, bias=0), auto tile sizing,
    # rows (256) divide the tile exactly.
    x1 = jax.random.normal(k1, (4, 64, n_state), dtype=jnp.float32)
    w1 = jnp.ones((n_state,), dtype=jnp.float32)
    b1 = jnp.zeros((n_state,), dtype=jnp.float32)
    out1 = jax.block_until_ready(layer_norm(x1, w1, b1, eps=1e-5))
    ref1 = _reference(x1, w1, b1, 1e-5)
    assert out1.shape == x1.shape and out1.dtype == x1.dtype
    assert float(jnp.max(jnp.abs(out1 - ref1))) < 1e-4

    # Case 2: ragged row count (45 rows) with a forced small tile so the grid
    # has multiple steps and a partially-valid last block (exercises the
    # no-pad boundary-masking path), plus non-trivial affine parameters.
    x2 = 3.0 * jax.random.normal(k2, (3, 15, n_state), dtype=jnp.float32) + 1.5
    w2 = jax.random.normal(k3, (n_state,), dtype=jnp.float32)
    b2 = jax.random.normal(k4, (n_state,), dtype=jnp.float32)
    out2 = jax.block_until_ready(layer_norm(x2, w2, b2, eps=1e-5, tile_rows=16))
    ref2 = _reference(x2, w2, b2, 1e-5)
    assert out2.shape == x2.shape and out2.dtype == x2.dtype
    assert float(jnp.max(jnp.abs(out2 - ref2))) < 2e-4

    # Case 3: tiny row count -> pure-jnp fallback path.
    x3 = jax.random.normal(k5, (1, 3, n_state), dtype=jnp.float32)
    out3 = jax.block_until_ready(layer_norm(x3, w1, b1, eps=1e-5))
    ref3 = _reference(x3, w1, b1, 1e-5)
    assert out3.shape == x3.shape and out3.dtype == x3.dtype
    assert float(jnp.max(jnp.abs(out3 - ref3))) < 1e-4

    print("KERNEL_OK")
</pallas_src>

<mosaic_0001>
module attributes {stable_mosaic.version = 11 : i64} {
  func.func @_layernorm_kernel(%arg0: i32, %arg1: memref<256x128xf32, #tpu.memory_space<vmem>>, %arg2: memref<1x128xf32, #tpu.memory_space<vmem>>, %arg3: memref<1x128xf32, #tpu.memory_space<vmem>>, %arg4: memref<256x128xf32, #tpu.memory_space<vmem>>) attributes {dimension_semantics = [#tpu.dimension_semantics<parallel>], iteration_bounds = array<i64: 1>, scalar_prefetch = 0 : i64, scratch_operands = 0 : i64, tpu.core_type = #tpu.core_type<tc>, window_params = [{transform_indices = @transform_0, window_bounds = array<i64: 256, 128>}, {pipeline_mode = #tpu.pipeline_mode<synchronous>, transform_indices = @transform_1, window_bounds = array<i64: 1, 128>}, {pipeline_mode = #tpu.pipeline_mode<synchronous>, transform_indices = @transform_2, window_bounds = array<i64: 1, 128>}, {transform_indices = @transform_3, window_bounds = array<i64: 256, 128>}]} {
    %c0 = arith.constant 0 : index
    %c0_0 = arith.constant 0 : index
    %0 = vector.load %arg1[%c0, %c0_0] : memref<256x128xf32, #tpu.memory_space<vmem>>, vector<256x128xf32>
    %cst = arith.constant dense<0.000000e+00> : vector<256xf32>
    %1 = vector.multi_reduction <add>, %0, %cst [1] : vector<256x128xf32> to vector<256xf32>
    %2 = vector.shape_cast %1 : vector<256xf32> to vector<256x1xf32>
    %cst_1 = arith.constant 7.812500e-03 : f32
    %3 = vector.broadcast %cst_1 : f32 to vector<256x1xf32>
    %4 = arith.mulf %2, %3 : vector<256x1xf32>
    %5 = vector.broadcast %4 : vector<256x1xf32> to vector<256x128xf32>
    %6 = arith.subf %0, %5 : vector<256x128xf32>
    %7 = arith.mulf %6, %6 : vector<256x128xf32>
    %cst_2 = arith.constant dense<0.000000e+00> : vector<256xf32>
    %8 = vector.multi_reduction <add>, %7, %cst_2 [1] : vector<256x128xf32> to vector<256xf32>
    %9 = vector.shape_cast %8 : vector<256xf32> to vector<256x1xf32>
    %cst_3 = arith.constant 7.812500e-03 : f32
    %10 = vector.broadcast %cst_3 : f32 to vector<256x1xf32>
    %11 = arith.mulf %9, %10 : vector<256x1xf32>
    %cst_4 = arith.constant 9.99999974E-6 : f32
    %12 = vector.broadcast %cst_4 : f32 to vector<256x1xf32>
    %13 = arith.addf %11, %12 : vector<256x1xf32>
    %14 = math.rsqrt %13 : vector<256x1xf32>
    %c0_5 = arith.constant 0 : index
    %c0_6 = arith.constant 0 : index
    %15 = vector.load %arg2[%c0_5, %c0_6] : memref<1x128xf32, #tpu.memory_space<vmem>>, vector<1x128xf32>
    %c0_7 = arith.constant 0 : index
    %c0_8 = arith.constant 0 : index
    %16 = vector.load %arg3[%c0_7, %c0_8] : memref<1x128xf32, #tpu.memory_space<vmem>>, vector<1x128xf32>
    %17 = vector.broadcast %14 : vector<256x1xf32> to vector<256x128xf32>
    %18 = arith.mulf %6, %17 : vector<256x128xf32>
    %19 = vector.broadcast %15 : vector<1x128xf32> to vector<256x128xf32>
    %20 = arith.mulf %18, %19 : vector<256x128xf32>
    %21 = vector.broadcast %16 : vector<1x128xf32> to vector<256x128xf32>
    %22 = arith.addf %20, %21 : vector<256x128xf32>
    %c0_9 = arith.constant 0 : index
    %c0_10 = arith.constant 0 : index
    %23 = vector.load %arg4[%c0_9, %c0_10] : memref<256x128xf32, #tpu.memory_space<vmem>>, vector<256x128xf32>
    tpu.vector_store %arg4[%c0_9, %c0_10], %22 {strides = array<i32>} : memref<256x128xf32, #tpu.memory_space<vmem>>, vector<256x128xf32>,
    return
  }
  func.func @transform_0(%arg0: i32) -> (i32, i32) {
    %c0_i32 = arith.constant 0 : i32
    %c0_i32_0 = arith.constant 0 : i32
    return %arg0, %c0_i32 : i32, i32
  }
  func.func @transform_1(%arg0: i32) -> (i32, i32) {
    %c0_i32 = arith.constant 0 : i32
    %c0_i32_0 = arith.constant 0 : i32
    %c0_i32_1 = arith.constant 0 : i32
    return %c0_i32, %c0_i32_0 : i32, i32
  }
  func.func @transform_2(%arg0: i32) -> (i32, i32) {
    %c0_i32 = arith.constant 0 : i32
    %c0_i32_0 = arith.constant 0 : i32
    %c0_i32_1 = arith.constant 0 : i32
    return %c0_i32, %c0_i32_0 : i32, i32
  }
  func.func @transform_3(%arg0: i32) -> (i32, i32) {
    %c0_i32 = arith.constant 0 : i32
    %c0_i32_0 = arith.constant 0 : i32
    return %arg0, %c0_i32 : i32, i32
  }
}

</mosaic_0001>

<bundles_post_ra>
// kernel: tpu_custom_call.1
= control target key start
LH: loop header
LB: loop body
LE: loop exit
PB: predicated region body
PF: predicated region fallthrough
CT: control target
= control target key end

     0   :  { %8 = vsyncpa [#allocation3], 0  ;;  %s1851_s0 = inlined_call_operand.hbm [shape: f32[256,128], index: 0, kind: input, shape index: {}]   ;;  %s1852_s1 = inlined_call_operand.hbm [shape: f32[1,128], index: 1, kind: input, shape index: {}]   ;;  %s1853_s2 = inlined_call_operand.vmem [shape: f32[1,128], index: 2, kind: input, shape index: {}]   ;;  %s1854_s3 = inlined_call_operand.hbm [shape: f32[256,128], index: 3, kind: output, shape index: {}]  }
   0x1   :  { %9 = vsyncpa [#allocation6], 0 }
   0x2   :  { %10 = vsyncpa [#allocation4], 0  ;;  %s15_s14 = sshll.u32 %s1851_s0, 4  ;;  %s992_s15 = smov [#allocation2]   ;;  %s16_s14 = int_to_ptr.hbm [resolvable:$true] %s15_s14 }
   0x3   :  { %s17_s16 = sshll.u32 %s992_s15, 4  ;;  %s29_s19 = sshll.u32 %s1852_s1, 4  ;;  %s18_s16 = int_to_ptr.vmem [resolvable:$true] %s17_s16  ;;  %s30_s19 = int_to_ptr.hbm [resolvable:$true] %s29_s19 }
   0x4   :  { %s993_s20 = smov 128   ;;  %s994_s21 = smov 8  }
   0x5   :  { %23 = dma.hbm_to_vmem [thread:$0]  %s16_s14, 4096, %s18_s16, [#allocation3], %s993_s20, %s993_s20, %s994_s21  }
   0x6   :  { %s995_s22 = smov [#allocation5]  }
   0x7   :  { %s31_s23 = sshll.u32 %s995_s22, 4  ;;  %s32_s23 = int_to_ptr.vmem [resolvable:$true] %s31_s23 }
   0x8   :  { %34 = dma.hbm_to_vmem [thread:$0]  %s30_s19, 16, %s32_s23, [#allocation6]  }
   0x9   :  { %986 = dma.done.wait [#allocation3], 4096  }
   0xa   :  { %987 = vsyncadd [#allocation3], 4294963200 }
   0xb   :  { %988 = dma.done.wait [#allocation6], 16  }
   0xc   :  { %989 = vsyncadd [#allocation6], 4294967280  ;;  %v1026_v0 = vld [vmem:[#allocation2 + $0x20] sm:$0xff]  ;;  %v1028_v1 = vld [vmem:[#allocation2 + $0x10] sm:$0xff]  ;;  %s996_s24 = smov [#allocation7]   ;;  %s827_s28 = sshll.u32 %s1854_s3, 4  ;;  %s828_s28 = int_to_ptr.hbm [resolvable:$true] %s827_s28 }
   0xd   :  { %v1030_v2 = vld [vmem:[#allocation2] sm:$0xff]  ;;  %85 = vadd.xlane.f32.xlu2 %v1026_v0  ;;  %81 = vadd.xlane.f32.xlu1 %v1028_v1  ;;  %v1035_v3 = vld [vmem:[#allocation2 + $0x28] sm:$0xff]  ;;  %v1037_v4 = vld [vmem:[#allocation2 + $0x18] sm:$0xff]  ;;  %s825_s25 = sshll.u32 %s996_s24, 4  ;;  %s826_s25 = int_to_ptr.vmem [resolvable:$true] %s825_s25 }
   0xe   :  { %77 = vadd.xlane.f32.xlu0 %v1030_v2  ;;  %v1039_v5 = vld [vmem:[#allocation2 + $0x8] sm:$0xff]  ;;  %v1044_v6 = vld [vmem:[#allocation2 + $0x40] sm:$0xff]  ;;  %v1046_v7 = vld [vmem:[#allocation2 + $0x38] sm:$0xff] }
   0xf   :  { %v1048_v8 = vld [vmem:[#allocation2 + $0x30] sm:$0xff]  ;;  %v1053_v9 = vld [vmem:[#allocation2 + $0x58] sm:$0xff]  ;;  %v1057_v11 = vld [vmem:[#allocation2 + $0x48] sm:$0xff] }
  0x10   :  { %v1055_v10 = vld [vmem:[#allocation2 + $0x50] sm:$0xff]  ;;  %v1064_v13 = vld [vmem:[#allocation2 + $0x68] sm:$0xff]  ;;  %v1066_v14 = vld [vmem:[#allocation2 + $0x60] sm:$0xff] }
  0x11   :  { %v1062_v12 = vld [vmem:[#allocation2 + $0x70] sm:$0xff]  ;;  %v1071_v15 = vld [vmem:[#allocation2 + $0x88] sm:$0xff]  ;;  %v1073_v16 = vld [vmem:[#allocation2 + $0x80] sm:$0xff] }
  0x12   :  { %v1075_v17 = vld [vmem:[#allocation2 + $0x78] sm:$0xff]  ;;  %v1080_v18 = vld [vmem:[#allocation2 + $0xa0] sm:$0xff]  ;;  %v1084_v20 = vld [vmem:[#allocation2 + $0x90] sm:$0xff] }
  0x13   :  { %v1082_v19 = vld [vmem:[#allocation2 + $0x98] sm:$0xff]  ;;  %v1091_v22 = vld [vmem:[#allocation2 + $0xb0] sm:$0xff]  ;;  %v1093_v23 = vld [vmem:[#allocation2 + $0xa8] sm:$0xff] }
  0x14   :  { %v1089_v21 = vld [vmem:[#allocation2 + $0xb8] sm:$0xff]  ;;  %v1098_v24 = vld [vmem:[#allocation2 + $0xd0] sm:$0xff]  ;;  %v1100_v25 = vld [vmem:[#allocation2 + $0xc8] sm:$0xff] }
  0x15   :  { %87 = vadd.xlane.f32.xlu2 %v1035_v3  ;;  %83 = vadd.xlane.f32.xlu1 %v1037_v4  ;;  %v1102_v26 = vld [vmem:[#allocation2 + $0xc0] sm:$0xff]  ;;  %v1107_v27 = vld [vmem:[#allocation2 + $0xe8] sm:$0xff]  ;;  %v1111_v29 = vld [vmem:[#allocation2 + $0xd8] sm:$0xff] }
  0x16   :  { %79 = vadd.xlane.f32.xlu0 %v1039_v5  ;;  %v1109_v28 = vld [vmem:[#allocation2 + $0xe0] sm:$0xff]  ;;  %v1116_v30 = vld [vmem:[#allocation2 + $0xf8] sm:$0xff]  ;;  %v1118_v31 = vld [vmem:[#allocation2 + $0xf0] sm:$0xff] }
  0x1d   :  { %93 = vadd.xlane.f32.xlu2 %v1044_v6  ;;  %91 = vadd.xlane.f32.xlu1 %v1046_v7 }
  0x1e   :  { %89 = vadd.xlane.f32.xlu0 %v1048_v8 }
  0x25   :  { %99 = vadd.xlane.f32.xlu2 %v1053_v9  ;;  %97 = vadd.xlane.f32.xlu1 %v1055_v10 }
  0x26   :  { %95 = vadd.xlane.f32.xlu0 %v1057_v11 }
  0x2d   :  { %105 = vadd.xlane.f32.xlu2 %v1062_v12  ;;  %103 = vadd.xlane.f32.xlu1 %v1064_v13 }
  0x2e   :  { %101 = vadd.xlane.f32.xlu0 %v1066_v14 }
  0x35   :  { %111 = vadd.xlane.f32.xlu2 %v1071_v15  ;;  %109 = vadd.xlane.f32.xlu1 %v1073_v16 }
  0x36   :  { %107 = vadd.xlane.f32.xlu0 %v1075_v17 }
  0x3d   :  { %117 = vadd.xlane.f32.xlu2 %v1080_v18  ;;  %115 = vadd.xlane.f32.xlu1 %v1082_v19 }
  0x3e   :  { %113 = vadd.xlane.f32.xlu0 %v1084_v20 }
  0x45   :  { %123 = vadd.xlane.f32.xlu2 %v1089_v21  ;;  %121 = vadd.xlane.f32.xlu1 %v1091_v22 }
  0x46   :  { %119 = vadd.xlane.f32.xlu0 %v1093_v23 }
  0x4d   :  { %129 = vadd.xlane.f32.xlu2 %v1098_v24  ;;  %127 = vadd.xlane.f32.xlu1 %v1100_v25 }
  0x4e   :  { %125 = vadd.xlane.f32.xlu0 %v1102_v26 }
  0x55   :  { %135 = vadd.xlane.f32.xlu2 %v1107_v27  ;;  %133 = vadd.xlane.f32.xlu1 %v1109_v28 }
  0x56   :  { %131 = vadd.xlane.f32.xlu0 %v1111_v29 }
  0x5d   :  { %139 = vadd.xlane.f32.xlu1 %v1116_v30 }
  0x5e   :  { %137 = vadd.xlane.f32.xlu0 %v1118_v31 }
  0x80   :  { %v86_v32 = vpop.xlane.xlu2 %85  ;;  %v82_v33 = vpop.xlane.xlu1 %81 }
  0x81   :  { %v143_v34 = vmul.f32 0.0078125, %v82_v33  ;;  %v78_v35 = vpop.xlane.xlu0 %77  ;;  %v145_v49 = vmul.f32 0.0078125, %v86_v32 }
  0x82   :  { %v141_v36 = vmul.f32 0.0078125, %v78_v35 }
  0x83   :  { %v1123_v37 = vsub.f32 %v1028_v1, %v143_v34  ;;  %v1148_v54 = vsub.f32 %v1026_v0, %v145_v49 }
  0x84   :  { %v1126_v38 = vsub.f32 %v1030_v2, %v141_v36 }
  0x85   :  { %v207_v39 = vmul.f32 %v1123_v37, %v1123_v37  ;;  %v209_v62 = vmul.f32 %v1148_v54, %v1148_v54 }
  0x86   :  { %v205_v40 = vmul.f32 %v1126_v38, %v1126_v38 }
  0x87   :  { %241 = vadd.xlane.f32.xlu1 %v207_v39 }
  0x88   :  { %237 = vadd.xlane.f32.xlu2 %v205_v40  ;;  %v88_v41 = vpop.xlane.xlu2 %87  ;;  %v84_v42 = vpop.xlane.xlu1 %83 }
  0x89   :  { %v146_v43 = vmul.f32 0.0078125, %v88_v41  ;;  %v144_v44 = vmul.f32 0.0078125, %v84_v42  ;;  %v80_v45 = vpop.xlane.xlu0 %79 }
  0x8a   :  { %v142_v46 = vmul.f32 0.0078125, %v80_v45 }
  0x8b   :  { %v1133_v47 = vsub.f32 %v1035_v3, %v146_v43  ;;  %v1136_v48 = vsub.f32 %v1037_v4, %v144_v44 }
  0x8c   :  { %v1139_v50 = vsub.f32 %v1039_v5, %v142_v46 }
  0x8d   :  { %v210_v51 = vmul.f32 %v1133_v47, %v1133_v47  ;;  %v208_v52 = vmul.f32 %v1136_v48, %v1136_v48 }
  0x8e   :  { %v206_v53 = vmul.f32 %v1139_v50, %v1139_v50 }
  0x8f   :  { %247 = vadd.xlane.f32.xlu1 %v210_v51 }
  0x90   :  { %243 = vadd.xlane.f32.xlu2 %v208_v52  ;;  %239 = vadd.xlane.f32.xlu0 %v206_v53  ;;  %v94_v55 = vpop.xlane.xlu2 %93  ;;  %v92_v56 = vpop.xlane.xlu1 %91 }
  0x91   :  { %v149_v57 = vmul.f32 0.0078125, %v94_v55  ;;  %v90_v58 = vpop.xlane.xlu0 %89  ;;  %v148_v63 = vmul.f32 0.0078125, %v92_v56 }
  0x92   :  { %v147_v59 = vmul.f32 0.0078125, %v90_v58 }
  0x93   :  { %v1151_v60 = vsub.f32 %v1044_v6, %v149_v57  ;;  %v1163_v3 = vsub.f32 %v1046_v7, %v148_v63 }
  0x94   :  { %v1154_v61 = vsub.f32 %v1048_v8, %v147_v59 }
  0x95   :  { %v213_v0 = vmul.f32 %v1151_v60, %v1151_v60  ;;  %v212_v34 = vmul.f32 %v1163_v3, %v1163_v3 }
  0x96   :  { %v211_v1 = vmul.f32 %v1154_v61, %v1154_v61 }
  0x97   :  { %253 = vadd.xlane.f32.xlu1 %v213_v0 }
  0x98   :  { %245 = vadd.xlane.f32.xlu0 %v209_v62  ;;  %249 = vadd.xlane.f32.xlu2 %v211_v1  ;;  %v100_v2 = vpop.xlane.xlu2 %99  ;;  %v98_v4 = vpop.xlane.xlu1 %97 }
  0x99   :  { %v152_v5 = vmul.f32 0.0078125, %v100_v2  ;;  %v96_v6 = vpop.xlane.xlu0 %95  ;;  %v151_v35 = vmul.f32 0.0078125, %v98_v4 }
  0x9a   :  { %v150_v8 = vmul.f32 0.0078125, %v96_v6 }
  0x9b   :  { %v1166_v32 = vsub.f32 %v1053_v9, %v152_v5  ;;  %v1178_v9 = vsub.f32 %v1055_v10, %v151_v35 }
  0x9c   :  { %v1169_v33 = vsub.f32 %v1057_v11, %v150_v8 }
  0x9d   :  { %v216_v36 = vmul.f32 %v1166_v32, %v1166_v32  ;;  %v215_v45 = vmul.f32 %v1178_v9, %v1178_v9 }
  0x9e   :  { %v214_v7 = vmul.f32 %v1169_v33, %v1169_v33 }
  0x9f   :  { %259 = vadd.xlane.f32.xlu1 %v216_v36 }
  0xa0   :  { %251 = vadd.xlane.f32.xlu0 %v212_v34  ;;  %255 = vadd.xlane.f32.xlu2 %v214_v7  ;;  %v106_v39 = vpop.xlane.xlu2 %105  ;;  %v104_v40 = vpop.xlane.xlu1 %103 }
  0xa1   :  { %v155_v11 = vmul.f32 0.0078125, %v106_v39  ;;  %v102_v41 = vpop.xlane.xlu0 %101  ;;  %v154_v46 = vmul.f32 0.0078125, %v104_v40 }
  0xa2   :  { %v153_v42 = vmul.f32 0.0078125, %v102_v41 }
  0xa3   :  { %v1181_v43 = vsub.f32 %v1062_v12, %v155_v11  ;;  %v1193_v12 = vsub.f32 %v1064_v13, %v154_v46 }
  0xa4   :  { %v1184_v44 = vsub.f32 %v1066_v14, %v153_v42 }
  0xa5   :  { %v219_v49 = vmul.f32 %v1181_v43, %v1181_v43  ;;  %v218_v58 = vmul.f32 %v1193_v12, %v1193_v12 }
  0xa6   :  { %v217_v10 = vmul.f32 %v1184_v44, %v1184_v44 }
  0xa7   :  { %265 = vadd.xlane.f32.xlu1 %v219_v49 }
  0xa8   :  { %257 = vadd.xlane.f32.xlu0 %v215_v45  ;;  %261 = vadd.xlane.f32.xlu2 %v217_v10  ;;  %v112_v51 = vpop.xlane.xlu2 %111  ;;  %v110_v52 = vpop.xlane.xlu1 %109 }
  0xa9   :  { %v158_v14 = vmul.f32 0.0078125, %v112_v51  ;;  %v108_v53 = vpop.xlane.xlu0 %107  ;;  %v157_v59 = vmul.f32 0.0078125, %v110_v52 }
  0xaa   :  { %v156_v55 = vmul.f32 0.0078125, %v108_v53 }
  0xab   :  { %v1196_v56 = vsub.f32 %v1071_v15, %v158_v14  ;;  %v1208_v15 = vsub.f32 %v1073_v16, %v157_v59 }
  0xac   :  { %v1199_v57 = vsub.f32 %v1075_v17, %v156_v55 }
  0xad   :  { %v222_v62 = vmul.f32 %v1196_v56, %v1196_v56  ;;  %v221_v6 = vmul.f32 %v1208_v15, %v1208_v15 }
  0xae   :  { %v220_v13 = vmul.f32 %v1199_v57, %v1199_v57 }
  0xaf   :  { %271 = vadd.xlane.f32.xlu1 %v222_v62 }
  0xb0   :  { %263 = vadd.xlane.f32.xlu0 %v218_v58  ;;  %267 = vadd.xlane.f32.xlu2 %v220_v13  ;;  %v118_v63 = vpop.xlane.xlu2 %117  ;;  %v116_v0 = vpop.xlane.xlu1 %115 }
  0xb1   :  { %v161_v17 = vmul.f32 0.0078125, %v118_v63  ;;  %v114_v1 = vpop.xlane.xlu0 %113  ;;  %v160_v8 = vmul.f32 0.0078125, %v116_v0 }
  0xb2   :  { %v159_v2 = vmul.f32 0.0078125, %v114_v1 }
  0xb3   :  { %v1211_v4 = vsub.f32 %v1080_v18, %v161_v17  ;;  %v1223_v18 = vsub.f32 %v1082_v19, %v160_v8 }
  0xb4   :  { %v1214_v5 = vsub.f32 %v1084_v20, %v159_v2 }
  0xb5   :  { %v225_v34 = vmul.f32 %v1211_v4, %v1211_v4  ;;  %v224_v41 = vmul.f32 %v1223_v18, %v1223_v18 }
  0xb6   :  { %v223_v16 = vmul.f32 %v1214_v5, %v1214_v5 }
  0xb7   :  { %277 = vadd.xlane.f32.xlu1 %v225_v34 }
  0xb8   :  { %269 = vadd.xlane.f32.xlu0 %v221_v6  ;;  %273 = vadd.xlane.f32.xlu2 %v223_v16  ;;  %v124_v35 = vpop.xlane.xlu2 %123  ;;  %v122_v36 = vpop.xlane.xlu1 %121 }
  0xb9   :  { %v164_v20 = vmul.f32 0.0078125, %v124_v35  ;;  %v120_v7 = vpop.xlane.xlu0 %119  ;;  %v163_v42 = vmul.f32 0.0078125, %v122_v36 }
  0xba   :  { %v162_v39 = vmul.f32 0.0078125, %v120_v7 }
  0xbb   :  { %v1226_v40 = vsub.f32 %v1089_v21, %v164_v20  ;;  %v1238_v21 = vsub.f32 %v1091_v22, %v163_v42 }
  0xbc   :  { %v1229_v11 = vsub.f32 %v1093_v23, %v162_v39 }
  0xbd   :  { %v228_v45 = vmul.f32 %v1226_v40, %v1226_v40  ;;  %v227_v53 = vmul.f32 %v1238_v21, %v1238_v21 }
  0xbe   :  { %v226_v19 = vmul.f32 %v1229_v11, %v1229_v11 }
  0xbf   :  { %283 = vadd.xlane.f32.xlu1 %v228_v45 }
  0xc0   :  { %275 = vadd.xlane.f32.xlu0 %v224_v41  ;;  %279 = vadd.xlane.f32.xlu2 %v226_v19  ;;  %v130_v46 = vpop.xlane.xlu2 %129  ;;  %v128_v49 = vpop.xlane.xlu1 %127 }
  0xc1   :  { %v167_v23 = vmul.f32 0.0078125, %v130_v46  ;;  %v126_v10 = vpop.xlane.xlu0 %125  ;;  %v166_v55 = vmul.f32 0.0078125, %v128_v49 }
  0xc2   :  { %v165_v51 = vmul.f32 0.0078125, %v126_v10 }
  0xc3   :  { %v1241_v52 = vsub.f32 %v1098_v24, %v167_v23  ;;  %v1253_v24 = vsub.f32 %v1100_v25, %v166_v55 }
  0xc4   :  { %v1244_v14 = vsub.f32 %v1102_v26, %v165_v51 }
  0xc5   :  { %v231_v58 = vmul.f32 %v1241_v52, %v1241_v52  ;;  %v230_v1 = vmul.f32 %v1253_v24, %v1253_v24 }
  0xc6   :  { %v229_v22 = vmul.f32 %v1244_v14, %v1244_v14 }
  0xc7   :  { %289 = vadd.xlane.f32.xlu1 %v231_v58 }
  0xc8   :  { %281 = vadd.xlane.f32.xlu0 %v227_v53  ;;  %285 = vadd.xlane.f32.xlu2 %v229_v22  ;;  %v136_v59 = vpop.xlane.xlu2 %135  ;;  %v134_v62 = vpop.xlane.xlu1 %133 }
  0xc9   :  { %v170_v26 = vmul.f32 0.0078125, %v136_v59  ;;  %v132_v13 = vpop.xlane.xlu0 %131  ;;  %v169_v2 = vmul.f32 0.0078125, %v134_v62 }
  0xca   :  { %v168_v63 = vmul.f32 0.0078125, %v132_v13 }
  0xcb   :  { %v1256_v0 = vsub.f32 %v1107_v27, %v170_v26  ;;  %v1268_v8 = vsub.f32 %v1109_v28, %v169_v2 }
  0xcc   :  { %v1259_v17 = vsub.f32 %v1111_v29, %v168_v63 }
  0xcd   :  { %v234_v6 = vmul.f32 %v1256_v0, %v1256_v0  ;;  %v233_v35 = vmul.f32 %v1268_v8, %v1268_v8 }
  0xce   :  { %v232_v25 = vmul.f32 %v1259_v17, %v1259_v17 }
  0xcf   :  { %295 = vadd.xlane.f32.xlu1 %v234_v6 }
  0xd0   :  { %287 = vadd.xlane.f32.xlu0 %v230_v1  ;;  %291 = vadd.xlane.f32.xlu2 %v232_v25  ;;  %v140_v34 = vpop.xlane.xlu1 %139 }
  0xd1   :  { %v138_v27 = vpop.xlane.xlu0 %137  ;;  %v172_v36 = vmul.f32 0.0078125, %v140_v34 }
  0xd2   :  { %v171_v29 = vmul.f32 0.0078125, %v138_v27 }
  0xd3   :  { %v1278_v7 = vsub.f32 %v1116_v30, %v172_v36 }
  0xd4   :  { %v1271_v16 = vsub.f32 %v1118_v31, %v171_v29 }
  0xd5   :  { %v236_v28 = vmul.f32 %v1278_v7, %v1278_v7 }
  0xd6   :  { %v235_v20 = vmul.f32 %v1271_v16, %v1271_v16 }
  0xd8   :  { %293 = vadd.xlane.f32.xlu0 %v233_v35  ;;  %297 = vadd.xlane.f32.xlu2 %v235_v20 }
  0xe0   :  { %299 = vadd.xlane.f32.xlu0 %v236_v28 }
  0xfa   :  { %v242_v39 = vpop.xlane.xlu1 %241 }
  0xfb   :  { %v303_v41 = vmul.f32 0.0078125, %v242_v39  ;;  %v238_v31 = vpop.xlane.xlu2 %237 }
  0xfc   :  { %v301_v42 = vmul.f32 0.0078125, %v238_v31 }
  0xfd   :  { %v335_v45 = vadd.f32 1e-05, %v303_v41 }
  0xfe   :  { %v333_v19 = vadd.f32 1e-05, %v301_v42 }
  0xff   :  { %848 = vrsqrt.f32 %v335_v45  ;;  %vm391_vm0 = vweird.f32 %v335_v45 }
 0x100   :  { %850 = vrsqrt.f32 %v333_v19  ;;  %vm371_vm2 = vweird.f32 %v333_v19 }
 0x102   :  { %v248_v46 = vpop.xlane.xlu1 %247 }
 0x103   :  { %v306_v49 = vmul.f32 0.0078125, %v248_v46  ;;  %v244_v23 = vpop.xlane.xlu2 %243  ;;  %v240_v10 = vpop.xlane.xlu0 %239 }
 0x104   :  { %v304_v51 = vmul.f32 0.0078125, %v244_v23  ;;  %v302_v53 = vmul.f32 0.0078125, %v240_v10 }
 0x105   :  { %v849_v30 = vpop.eup %848  ;;  %v1282_v55 = vadd.f32 1e-05, %v306_v49  ;;  %v1305_v49 = vld [vmem:[#allocation5] ss:$0 sm:$0xff] }
 0x106   :  { %v851_v58 = vpop.eup %850  ;;  %v386_v22 = vmul.f32 %v849_v30, %v335_v45  ;;  %v1284_v59 = vadd.f32 1e-05, %v304_v51  ;;  %v1286_v62 = vadd.f32 1e-05, %v302_v53  ;;  %vm392_vm1 = vweird.f32 %v849_v30  ;;  %v1321_v45 = vld [vmem:[%s1853_s2] ss:$0 sm:$0xff] }
 0x107   :  { %v366_v26 = vmul.f32 %v851_v58, %v333_v19  ;;  %852 = vrsqrt.f32 %v1282_v55  ;;  %vm372_vm3 = vweird.f32 %v851_v58  ;;  %vm421_vm4 = vweird.f32 %v1282_v55  ;;  %vm393_vm6 = vmor %vm391_vm0, %vm392_vm1 }
 0x108   :  { %v387_v13 = vmul.f32 %v849_v30, %v386_v22  ;;  %854 = vrsqrt.f32 %v1284_v59  ;;  %vm401_vm5 = vweird.f32 %v1284_v59  ;;  %vm373_vm7 = vmor %vm371_vm2, %vm372_vm3  ;;  %vm381_vm8 = vweird.f32 %v1286_v62 }
 0x109   :  { %v367_v63 = vmul.f32 %v851_v58, %v366_v26  ;;  %856 = vrsqrt.f32 %v1286_v62 }
 0x10a   :  { %v388_v1 = vmul.f32 0.5, %v387_v13  ;;  %v254_v2 = vpop.xlane.xlu1 %253 }
 0x10b   :  { %v368_v6 = vmul.f32 0.5, %v367_v63  ;;  %v309_v25 = vmul.f32 0.0078125, %v254_v2  ;;  %v250_v27 = vpop.xlane.xlu2 %249  ;;  %v246_v34 = vpop.xlane.xlu0 %245 }
 0x10c   :  { %v389_v29 = vsub.f32 1.5, %v388_v1  ;;  %v307_v35 = vmul.f32 0.0078125, %v250_v27  ;;  %v305_v51 = vmul.f32 0.0078125, %v246_v34 }
 0x10d   :  { %v1291_v36 = vpop.eup %852  ;;  %v369_v20 = vsub.f32 1.5, %v368_v6  ;;  %v1294_v28 = vadd.f32 1e-05, %v309_v25 }
 0x10e   :  { %v1296_v39 = vpop.eup %854  ;;  %v390_v41 = vmul.f32 %v849_v30, %v389_v29  ;;  %v416_v31 = vmul.f32 %v1291_v36, %v1282_v55  ;;  %v1301_v42 = vadd.f32 1e-05, %v307_v35  ;;  %vm422_vm9 = vweird.f32 %v1291_v36 }
 0x10f   :  { %v1303_v46 = vpop.eup %856  ;;  %v370_v23 = vmul.f32 %v851_v58, %v369_v20  ;;  %v396_v10 = vmul.f32 %v1296_v39, %v1284_v59  ;;  %858 = vrsqrt.f32 %v1294_v28  ;;  %vm402_vm10 = vweird.f32 %v1296_v39  ;;  %vm1341_vm11 = vmor %vm421_vm4, %vm422_vm9 }
 0x110   :  { %v394_v53 = vsel %vm393_vm6, %v849_v30, %v390_v41  ;;  %v417_v22 = vmul.f32 %v1291_v36, %v416_v31  ;;  %v376_v26 = vmul.f32 %v1303_v46, %v1286_v62  ;;  %860 = vrsqrt.f32 %v1301_v42  ;;  %vm403_vm15 = vmor %vm401_vm5, %vm402_vm10 }
 0x111   :  { %v689_v13 = vmul.f32 %v394_v53, %v1123_v37  ;;  %v374_v63 = vsel %vm373_vm7, %v851_v58, %v370_v23  ;;  %v397_v19 = vmul.f32 %v1296_v39, %v396_v10  ;;  %v1331_v34 = vadd.f32 1e-05, %v305_v51 }
 0x112   :  { %v687_v30 = vmul.f32 %v374_v63, %v1126_v38  ;;  %v418_v1 = vmul.f32 0.5, %v417_v22  ;;  %v377_v2 = vmul.f32 %v1303_v46, %v376_v26  ;;  %v260_v6 = vpop.xlane.xlu1 %259  ;;  %vm382_vm12 = vweird.f32 %v1303_v46 }
 0x113   :  { %v724_v25 = vmul.f32 %v1305_v49, %v689_v13  ;;  %v398_v27 = vmul.f32 0.5, %v397_v19  ;;  %v256_v37 = vpop.xlane.xlu2 %255  ;;  %v252_v58 = vpop.xlane.xlu0 %251  ;;  %v312_v38 = vmul.f32 0.0078125, %v260_v6  ;;  %862 = vrsqrt.f32 %v1331_v34  ;;  %vm383_vm0 = vmor %vm381_vm8, %vm382_vm12 }
 0x114   :  { %v722_v29 = vmul.f32 %v1305_v49, %v687_v30  ;;  %v419_v35 = vsub.f32 1.5, %v418_v1  ;;  %v378_v20 = vmul.f32 0.5, %v377_v2  ;;  %vm451_vm13 = vweird.f32 %v1294_v28 }
 0x115   :  { %v1334_v41 = vpop.eup %858  ;;  %v759_v31 = vadd.f32 %v1321_v45, %v724_v25  ;;  %v399_v10 = vsub.f32 1.5, %v398_v27  ;;  %v1354_v13 = vadd.f32 1e-05, %v312_v38  ;;  %v310_v2 = vmul.f32 0.0078125, %v256_v37 }
 0x116   :  { %v757_v51 = vadd.f32 %v1321_v45, %v722_v29  ;;  %v420_v53 = vmul.f32 %v1291_v36, %v419_v35  ;;  %v379_v22 = vsub.f32 1.5, %v378_v20  ;;  %v446_v26 = vmul.f32 %v1334_v41, %v1294_v28  ;;  %v1356_v63 = vpop.eup %860 }
 0x117   :  { %791 = vst [vmem:[#allocation7 + $0x10] sm:$0xff] %v759_v31  ;;  %v400_v55 = vmul.f32 %v1296_v39, %v399_v10  ;;  %vm452_vm14 = vweird.f32 %v1334_v41  ;;  %v308_v27 = vmul.f32 0.0078125, %v252_v58  ;;  %864 = vrsqrt.f32 %v1354_v13 }
 0x118   :  { %789 = vst [vmem:[#allocation7] sm:$0xff] %v757_v51  ;;  %v424_v19 = vsel %vm1341_vm11, %v1291_v36, %v420_v53  ;;  %v380_v30 = vmul.f32 %v1303_v46, %v379_v22  ;;  %v447_v1 = vmul.f32 %v1334_v41, %v446_v26  ;;  %v426_v36 = vmul.f32 %v1356_v63, %v1301_v42  ;;  %vm1393_vm2 = vmor %vm451_vm13, %vm452_vm14 }
 0x119   :  { %v692_v6 = vmul.f32 %v424_v19, %v1133_v47  ;;  %v404_v25 = vsel %vm403_vm15, %v1296_v39, %v400_v55  ;;  %v1378_v47 = vpop.eup %862  ;;  %vm431_vm1 = vweird.f32 %v1301_v42  ;;  %v1397_v53 = vadd.f32 1e-05, %v310_v2 }
 0x11a   :  { %v690_v59 = vmul.f32 %v404_v25, %v1136_v48  ;;  %v384_v29 = vsel %vm383_vm0, %v1303_v46, %v380_v30  ;;  %v448_v35 = vmul.f32 0.5, %v447_v1  ;;  %v266_v37 = vpop.xlane.xlu1 %265  ;;  %v427_v62 = vmul.f32 %v1356_v63, %v426_v36 }
 0x11b   :  { %v727_v39 = vmul.f32 %v1305_v49, %v692_v6  ;;  %v688_v20 = vmul.f32 %v384_v29, %v1139_v50  ;;  %v262_v38 = vpop.xlane.xlu2 %261  ;;  %v258_v31 = vpop.xlane.xlu0 %257  ;;  %v406_v48 = vmul.f32 %v1378_v47, %v1331_v34  ;;  %v1402_v19 = vadd.f32 1e-05, %v308_v27 }
 0x11c   :  { %v725_v58 = vmul.f32 %v1305_v49, %v690_v59  ;;  %v449_v23 = vsub.f32 1.5, %v448_v35  ;;  %v428_v51 = vmul.f32 0.5, %v427_v62  ;;  %vm432_vm3 = vweird.f32 %v1356_v63 }
 0x11d   :  { %v762_v46 = vadd.f32 %v1321_v45, %v727_v39  ;;  %v723_v10 = vmul.f32 %v1305_v49, %v688_v20  ;;  %v407_v55 = vmul.f32 %v1378_v47, %v406_v48  ;;  %866 = vrsqrt.f32 %v1397_v53  ;;  %v1407_v28 = vpop.eup %864  ;;  %vm433_vm6 = vmor %vm431_vm1, %vm432_vm3 }
 0x11e   :  { %v760_v22 = vadd.f32 %v1321_v45, %v725_v58  ;;  %v450_v26 = vmul.f32 %v1334_v41, %v449_v23  ;;  %v429_v1 = vsub.f32 1.5, %v428_v51  ;;  %vm411_vm4 = vweird.f32 %v1331_v34 }
 0x11f   :  { %794 = vst [vmem:[#allocation7 + $0x28] sm:$0xff] %v762_v46  ;;  %v758_v30 = vadd.f32 %v1321_v45, %v723_v10  ;;  %v408_v6 = vmul.f32 0.5, %v407_v55  ;;  %868 = vrsqrt.f32 %v1402_v19  ;;  %vm412_vm5 = vweird.f32 %v1378_v47 }
 0x120   :  { %792 = vst [vmem:[#allocation7 + $0x18] sm:$0xff] %v760_v22  ;;  %v454_v2 = vsel %vm1393_vm2, %v1334_v41, %v450_v26  ;;  %v430_v36 = vmul.f32 %v1356_v63, %v429_v1  ;;  %v476_v27 = vmul.f32 %v1407_v28, %v1354_v13  ;;  %v315_v41 = vmul.f32 0.0078125, %v266_v37  ;;  %vm413_vm8 = vmor %vm411_vm4, %vm412_vm5 }
 0x121   :  { %790 = vst [vmem:[#allocation7 + $0x8] sm:$0xff] %v758_v30  ;;  %v695_v25 = vmul.f32 %v454_v2, %v1151_v60  ;;  %v409_v59 = vsub.f32 1.5, %v408_v6  ;;  %v313_v29 = vmul.f32 0.0078125, %v262_v38  ;;  %v311_v35 = vmul.f32 0.0078125, %v258_v31 }
 0x122   :  { %v272_v39 = vpop.xlane.xlu1 %271  ;;  %v434_v62 = vsel %vm433_vm6, %v1356_v63, %v430_v36  ;;  %v477_v60 = vmul.f32 %v1407_v28, %v476_v27  ;;  %vm481_vm7 = vweird.f32 %v1354_v13  ;;  %v1427_v42 = vadd.f32 1e-05, %v315_v41 }
 0x123   :  { %v730_v20 = vmul.f32 %v1305_v49, %v695_v25  ;;  %v318_v58 = vmul.f32 0.0078125, %v272_v39  ;;  %v268_v23 = vpop.xlane.xlu2 %267  ;;  %v264_v48 = vpop.xlane.xlu0 %263  ;;  %v693_v46 = vmul.f32 %v434_v62, %v1154_v61  ;;  %v410_v10 = vmul.f32 %v1378_v47, %v409_v59 }
 0x124   :  { %v1429_v37 = vpop.eup %866  ;;  %v478_v63 = vmul.f32 0.5, %v477_v60  ;;  %vm482_vm9 = vweird.f32 %v1407_v28  ;;  %v1437_v31 = vadd.f32 1e-05, %v313_v29  ;;  %v1445_v26 = vadd.f32 1e-05, %v311_v35 }
 0x125   :  { %v765_v38 = vadd.f32 %v1321_v45, %v730_v20  ;;  %v1439_v61 = vpop.eup %868  ;;  %v728_v50 = vmul.f32 %v1305_v49, %v693_v46  ;;  %v414_v51 = vsel %vm413_vm8, %v1378_v47, %v410_v10  ;;  %v456_v22 = vmul.f32 %v1429_v37, %v1397_v53  ;;  %vm1455_vm10 = vmor %vm481_vm7, %vm482_vm9 }
 0x126   :  { %v691_v34 = vmul.f32 %v414_v51, %v1148_v54  ;;  %v479_v55 = vsub.f32 1.5, %v478_v63  ;;  %v436_v30 = vmul.f32 %v1439_v61, %v1402_v19  ;;  %v1450_v1 = vadd.f32 1e-05, %v318_v58 }
 0x127   :  { %797 = vst [vmem:[#allocation7 + $0x40] sm:$0xff] %v765_v38  ;;  %v763_v2 = vadd.f32 %v1321_v45, %v728_v50  ;;  %v457_v6 = vmul.f32 %v1429_v37, %v456_v22  ;;  %vm461_vm11 = vweird.f32 %v1397_v53  ;;  %870 = vrsqrt.f32 %v1427_v42 }
 0x128   :  { %v726_v54 = vmul.f32 %v1305_v49, %v691_v34  ;;  %v480_v25 = vmul.f32 %v1407_v28, %v479_v55  ;;  %v437_v36 = vmul.f32 %v1439_v61, %v436_v30  ;;  %872 = vrsqrt.f32 %v1437_v31 }
 0x129   :  { %795 = vst [vmem:[#allocation7 + $0x30] sm:$0xff] %v763_v2  ;;  %v458_v13 = vmul.f32 0.5, %v457_v6  ;;  %vm462_vm12 = vweird.f32 %v1429_v37  ;;  %vm441_vm13 = vweird.f32 %v1402_v19  ;;  %874 = vrsqrt.f32 %v1445_v26 }
 0x12a   :  { %v761_v27 = vadd.f32 %v1321_v45, %v726_v54  ;;  %v484_v59 = vsel %vm1455_vm10, %v1407_v28, %v480_v25  ;;  %v438_v41 = vmul.f32 0.5, %v437_v36  ;;  %876 = vrsqrt.f32 %v1450_v1  ;;  %v278_v29 = vpop.xlane.xlu1 %277  ;;  %vm463_vm2 = vmor %vm461_vm11, %vm462_vm12 }
 0x12b   :  { %v274_v35 = vpop.xlane.xlu2 %273  ;;  %v698_v39 = vmul.f32 %v484_v59, %v1166_v32  ;;  %v459_v20 = vsub.f32 1.5, %v458_v13  ;;  %vm442_vm14 = vweird.f32 %v1439_v61  ;;  %v316_v62 = vmul.f32 0.0078125, %v268_v23  ;;  %v270_v60 = vpop.xlane.xlu0 %269 }
 0x12c   :  { %793 = vst [vmem:[#allocation7 + $0x20] sm:$0xff] %v761_v27  ;;  %v439_v58 = vsub.f32 1.5, %v438_v41  ;;  %vm511_vm15 = vweird.f32 %v1427_v42  ;;  %vm491_vm0 = vweird.f32 %v1437_v31  ;;  %v314_v46 = vmul.f32 0.0078125, %v264_v48  ;;  %vm443_vm3 = vmor %vm441_vm13, %vm442_vm14 }
 0x12d   :  { %v1478_v28 = vpop.eup %870  ;;  %v733_v10 = vmul.f32 %v1305_v49, %v698_v39  ;;  %v460_v38 = vmul.f32 %v1429_v37, %v459_v20  ;;  %vm541_vm1 = vweird.f32 %v1450_v1  ;;  %v321_v32 = vmul.f32 0.0078125, %v278_v29 }
 0x12e   :  { %v319_v63 = vmul.f32 0.0078125, %v274_v35  ;;  %v1483_v50 = vpop.eup %872  ;;  %v440_v23 = vmul.f32 %v1439_v61, %v439_v58  ;;  %v506_v48 = vmul.f32 %v1478_v28, %v1427_v42  ;;  %v1492_v51 = vadd.f32 1e-05, %v316_v62 }
 0x12f   :  { %v317_v22 = vmul.f32 0.0078125, %v270_v60  ;;  %v1494_v34 = vpop.eup %874  ;;  %v768_v55 = vadd.f32 %v1321_v45, %v733_v10  ;;  %v464_v30 = vsel %vm463_vm2, %v1429_v37, %v460_v38  ;;  %vm512_vm4 = vweird.f32 %v1478_v28 }
 0x130   :  { %v486_v53 = vmul.f32 %v1483_v50, %v1437_v31  ;;  %v877_v2 = vpop.eup %876  ;;  %v696_v47 = vmul.f32 %v464_v30, %v1169_v33  ;;  %v444_v6 = vsel %vm443_vm3, %v1439_v61, %v440_v23  ;;  %v507_v54 = vmul.f32 %v1478_v28, %v506_v48  ;;  %vm1526_vm7 = vmor %vm511_vm15, %vm512_vm4 }
 0x131   :  { %v466_v37 = vmul.f32 %v1494_v34, %v1445_v26  ;;  %800 = vst [vmem:[#allocation7 + $0x58] sm:$0xff] %v768_v55  ;;  %v694_v25 = vmul.f32 %v444_v6, %v1163_v3  ;;  %v536_v36 = vmul.f32 %v877_v2, %v1450_v1  ;;  %v1513_v13 = vadd.f32 1e-05, %v314_v46 }
 0x132   :  { %v487_v19 = vmul.f32 %v1483_v50, %v486_v53  ;;  %v731_v27 = vmul.f32 %v1305_v49, %v696_v47  ;;  %v508_v59 = vmul.f32 0.5, %v507_v54  ;;  %vm492_vm5 = vweird.f32 %v1483_v50 }
 0x133   :  { %v467_v33 = vmul.f32 %v1494_v34, %v466_v37  ;;  %v729_v61 = vmul.f32 %v1305_v49, %v694_v25  ;;  %v537_v29 = vmul.f32 %v877_v2, %v536_v36  ;;  %878 = vrsqrt.f32 %v1492_v51  ;;  %v1535_v23 = vpop.xlane.xlu0 %275  ;;  %vm1542_vm9 = vmor %vm491_vm0, %vm492_vm5 }
 0x134   :  { %v488_v41 = vmul.f32 0.5, %v487_v19  ;;  %v766_v3 = vadd.f32 %v1321_v45, %v731_v27  ;;  %v509_v35 = vsub.f32 1.5, %v508_v59  ;;  %vm542_vm6 = vweird.f32 %v877_v2 }
 0x135   :  { %v468_v39 = vmul.f32 0.5, %v467_v33  ;;  %v764_v20 = vadd.f32 %v1321_v45, %v729_v61  ;;  %v538_v58 = vmul.f32 0.5, %v537_v29  ;;  %880 = vrsqrt.f32 %v1513_v13  ;;  %vm1556_vm11 = vmor %vm541_vm1, %vm542_vm6 }
 0x136   :  { %v489_v60 = vsub.f32 1.5, %v488_v41  ;;  %798 = vst [vmem:[#allocation7 + $0x48] sm:$0xff] %v766_v3  ;;  %v510_v46 = vmul.f32 %v1478_v28, %v509_v35  ;;  %vm472_vm8 = vweird.f32 %v1494_v34  ;;  %v1533_v38 = vadd.f32 1e-05, %v321_v32  ;;  %v280_v32 = vpop.xlane.xlu2 %279 }
 0x137   :  { %v469_v10 = vsub.f32 1.5, %v468_v39  ;;  %796 = vst [vmem:[#allocation7 + $0x38] sm:$0xff] %v764_v20  ;;  %vm471_vm10 = vweird.f32 %v1445_v26  ;;  %v539_v55 = vsub.f32 1.5, %v538_v58  ;;  %v1547_v30 = vadd.f32 1e-05, %v319_v63  ;;  %v284_v63 = vpop.xlane.xlu1 %283 }
 0x138   :  { %v490_v42 = vmul.f32 %v1483_v50, %v489_v60  ;;  %v514_v53 = vsel %vm1526_vm7, %v1478_v28, %v510_v46  ;;  %882 = vrsqrt.f32 %v1533_v38  ;;  %v1561_v26 = vadd.f32 1e-05, %v317_v22  ;;  %vm473_vm12 = vmor %vm471_vm10, %vm472_vm8 }
 0x139   :  { %v470_v47 = vmul.f32 %v1494_v34, %v469_v10  ;;  %v1563_v6 = vpop.eup %878  ;;  %v701_v54 = vmul.f32 %v514_v53, %v1181_v43  ;;  %v540_v1 = vmul.f32 %v877_v2, %v539_v55  ;;  %884 = vrsqrt.f32 %v1547_v30 }
 0x13a   :  { %v494_v28 = vsel %vm1542_vm9, %v1483_v50, %v490_v42  ;;  %v516_v25 = vmul.f32 %v1563_v6, %v1492_v51  ;;  %vm521_vm13 = vweird.f32 %v1492_v51  ;;  %vm501_vm14 = vweird.f32 %v1513_v13 }
 0x13b   :  { %v699_v37 = vmul.f32 %v494_v28, %v1184_v44  ;;  %v474_v22 = vsel %vm473_vm12, %v1494_v34, %v470_v47  ;;  %v1576_v19 = vpop.eup %880  ;;  %v736_v43 = vmul.f32 %v1305_v49, %v701_v54  ;;  %v544_v50 = vsel %vm1556_vm11, %v877_v2, %v540_v1  ;;  %v1608_v46 = vpop.xlane.xlu0 %281 }
 0x13c   :  { %v697_v36 = vmul.f32 %v474_v22, %v1178_v9  ;;  %v704_v44 = vmul.f32 %v544_v50, %v1196_v56  ;;  %v517_v34 = vmul.f32 %v1563_v6, %v516_v25  ;;  %v496_v59 = vmul.f32 %v1576_v19, %v1513_v13 }
 0x13d   :  { %v734_v27 = vmul.f32 %v1305_v49, %v699_v37  ;;  %v771_v33 = vadd.f32 %v1321_v45, %v736_v43  ;;  %vm571_vm15 = vweird.f32 %v1533_v38  ;;  %886 = vrsqrt.f32 %v1561_v26 }
 0x13e   :  { %v732_v9 = vmul.f32 %v1305_v49, %v697_v36  ;;  %v1593_v2 = vpop.eup %882  ;;  %v739_v56 = vmul.f32 %v1305_v49, %v704_v44  ;;  %v518_v41 = vmul.f32 0.5, %v517_v34  ;;  %v497_v29 = vmul.f32 %v1576_v19, %v496_v59  ;;  %v286_v55 = vpop.xlane.xlu2 %285 }
 0x13f   :  { %v769_v61 = vadd.f32 %v1321_v45, %v734_v27  ;;  %v1598_v3 = vpop.eup %884  ;;  %803 = vst [vmem:[#allocation7 + $0x70] sm:$0xff] %v771_v33  ;;  %vm522_vm0 = vweird.f32 %v1563_v6  ;;  %v566_v39 = vmul.f32 %v1593_v2, %v1533_v38  ;;  %vm551_vm1 = vweird.f32 %v1547_v30  ;;  %v290_v54 = vpop.xlane.xlu1 %289 }
 0x140   :  { %v767_v35 = vadd.f32 %v1321_v45, %v732_v9  ;;  %v774_v20 = vadd.f32 %v1321_v45, %v739_v56  ;;  %v519_v62 = vsub.f32 1.5, %v518_v41  ;;  %v498_v60 = vmul.f32 0.5, %v497_v29  ;;  %vm523_vm4 = vmor %vm521_vm13, %vm522_vm0 }
 0x141   :  { %801 = vst [vmem:[#allocation7 + $0x60] sm:$0xff] %v769_v61  ;;  %v546_v58 = vmul.f32 %v1598_v3, %v1547_v30  ;;  %vm502_vm2 = vweird.f32 %v1576_v19  ;;  %v567_v10 = vmul.f32 %v1593_v2, %v566_v39  ;;  %v324_v42 = vmul.f32 0.0078125, %v284_v63 }
 0x142   :  { %799 = vst [vmem:[#allocation7 + $0x50] sm:$0xff] %v767_v35  ;;  %v322_v48 = vmul.f32 0.0078125, %v280_v32  ;;  %v520_v53 = vmul.f32 %v1563_v6, %v519_v62  ;;  %v499_v47 = vsub.f32 1.5, %v498_v60  ;;  %vm572_vm3 = vweird.f32 %v1593_v2  ;;  %vm503_vm5 = vmor %vm501_vm14, %vm502_vm2 }
 0x143   :  { %806 = vst [vmem:[#allocation7 + $0x88] sm:$0xff] %v774_v20  ;;  %v547_v31 = vmul.f32 %v1598_v3, %v546_v58  ;;  %v887_v28 = vpop.eup %886  ;;  %v568_v1 = vmul.f32 0.5, %v567_v10  ;;  %v1619_v37 = vadd.f32 1e-05, %v324_v42  ;;  %v320_v63 = vmul.f32 0.0078125, %v1535_v23  ;;  %vm1638_vm6 = vmor %vm571_vm15, %vm572_vm3  ;;  %v1662_v39 = vpop.xlane.xlu0 %287 }
 0x144   :  { %v1621_v32 = vadd.f32 1e-05, %v322_v48  ;;  %v524_v22 = vsel %vm523_vm4, %v1563_v6, %v520_v53  ;;  %v500_v25 = vmul.f32 %v1576_v19, %v499_v47  ;;  %v526_v36 = vmul.f32 %v887_v28, %v1561_v26 }
 0x145   :  { %v548_v43 = vmul.f32 0.5, %v547_v31  ;;  %v702_v50 = vmul.f32 %v524_v22, %v1199_v57  ;;  %v569_v51 = vsub.f32 1.5, %v568_v1  ;;  %888 = vrsqrt.f32 %v1619_v37 }
 0x146   :  { %v327_v27 = vmul.f32 0.0078125, %v290_v54  ;;  %v504_v23 = vsel %vm503_vm5, %v1576_v19, %v500_v25  ;;  %vm552_vm7 = vweird.f32 %v1598_v3  ;;  %v527_v44 = vmul.f32 %v887_v28, %v526_v36  ;;  %v292_v30 = vpop.xlane.xlu2 %291 }
 0x147   :  { %v549_v57 = vsub.f32 1.5, %v548_v43  ;;  %v737_v13 = vmul.f32 %v1305_v49, %v702_v50  ;;  %v700_v34 = vmul.f32 %v504_v23, %v1193_v12  ;;  %v570_v59 = vmul.f32 %v1593_v2, %v569_v51  ;;  %vm553_vm9 = vmor %vm551_vm1, %vm552_vm7  ;;  %v296_v31 = vpop.xlane.xlu1 %295 }
 0x148   :  { %890 = vrsqrt.f32 %v1621_v32  ;;  %v528_v33 = vmul.f32 0.5, %v527_v44  ;;  %vm532_vm8 = vweird.f32 %v887_v28  ;;  %v1648_v38 = vadd.f32 1e-05, %v320_v63 }
 0x149   :  { %v550_v19 = vmul.f32 %v1598_v3, %v549_v57  ;;  %v772_v9 = vadd.f32 %v1321_v45, %v737_v13  ;;  %v735_v61 = vmul.f32 %v1305_v49, %v700_v34  ;;  %v574_v56 = vsel %vm1638_vm6, %v1593_v2, %v570_v59 }
 0x14a   :  { %v1657_v12 = vadd.f32 1e-05, %v327_v27  ;;  %v707_v41 = vmul.f32 %v574_v56, %v1211_v4  ;;  %v529_v35 = vsub.f32 1.5, %v528_v33  ;;  %892 = vrsqrt.f32 %v1648_v38 }
 0x14b   :  { %v554_v29 = vsel %vm553_vm9, %v1598_v3, %v550_v19  ;;  %v1664_v20 = vpop.eup %888  ;;  %804 = vst [vmem:[#allocation7 + $0x78] sm:$0xff] %v772_v9  ;;  %v770_v62 = vadd.f32 %v1321_v45, %v735_v61  ;;  %vm531_vm10 = vweird.f32 %v1561_v26  ;;  %vm601_vm12 = vweird.f32 %v1619_v37  ;;  %v1719_v59 = vpop.xlane.xlu0 %293 }
 0x14c   :  { %v705_v2 = vmul.f32 %v554_v29, %v1214_v5  ;;  %894 = vrsqrt.f32 %v1657_v12  ;;  %v742_v60 = vmul.f32 %v1305_v49, %v707_v41  ;;  %v530_v4 = vmul.f32 %v887_v28, %v529_v35  ;;  %vm533_vm11 = vmor %vm531_vm10, %vm532_vm8 }
 0x14d   :  { %v596_v3 = vmul.f32 %v1664_v20, %v1619_v37  ;;  %802 = vst [vmem:[#allocation7 + $0x68] sm:$0xff] %v770_v62  ;;  %v325_v5 = vmul.f32 0.0078125, %v286_v55  ;;  %v323_v42 = vmul.f32 0.0078125, %v1608_v46  ;;  %vm581_vm13 = vweird.f32 %v1621_v32 }
 0x14e   :  { %v1673_v58 = vpop.eup %890  ;;  %v740_v10 = vmul.f32 %v1305_v49, %v705_v2  ;;  %v777_v48 = vadd.f32 %v1321_v45, %v742_v60  ;;  %v534_v53 = vsel %vm533_vm11, %v887_v28, %v530_v4  ;;  %vm602_vm14 = vweird.f32 %v1664_v20  ;;  %v298_v9 = vpop.xlane.xlu2 %297 }
 0x14f   :  { %v597_v26 = vmul.f32 %v1664_v20, %v596_v3  ;;  %v576_v47 = vmul.f32 %v1673_v58, %v1621_v32  ;;  %v703_v1 = vmul.f32 %v534_v53, %v1208_v15  ;;  %v1686_v63 = vadd.f32 1e-05, %v325_v5  ;;  %vm1709_vm1 = vmor %vm601_vm12, %vm602_vm14 }
 0x150   :  { %v775_v54 = vadd.f32 %v1321_v45, %v740_v10  ;;  %v1688_v55 = vpop.eup %892  ;;  %809 = vst [vmem:[#allocation7 + $0xa0] sm:$0xff] %v777_v48  ;;  %v1692_v22 = vadd.f32 1e-05, %v323_v42  ;;  %vm561_vm15 = vweird.f32 %v1648_v38  ;;  %v330_v36 = vmul.f32 0.0078125, %v296_v31 }
 0x151   :  { %v598_v46 = vmul.f32 0.5, %v597_v26  ;;  %v577_v28 = vmul.f32 %v1673_v58, %v576_v47  ;;  %v738_v43 = vmul.f32 %v1305_v49, %v703_v1  ;;  %v556_v15 = vmul.f32 %v1688_v55, %v1648_v38 }
 0x152   :  { %v1694_v25 = vpop.eup %894  ;;  %807 = vst [vmem:[#allocation7 + $0x90] sm:$0xff] %v775_v54  ;;  %896 = vrsqrt.f32 %v1686_v63  ;;  %vm631_vm0 = vweird.f32 %v1657_v12  ;;  %vm582_vm2 = vweird.f32 %v1673_v58  ;;  %vm562_vm3 = vweird.f32 %v1688_v55 }
 0x153   :  { %v599_v50 = vsub.f32 1.5, %v598_v46  ;;  %v578_v51 = vmul.f32 0.5, %v577_v28  ;;  %v626_v27 = vmul.f32 %v1694_v25, %v1657_v12  ;;  %v773_v23 = vadd.f32 %v1321_v45, %v738_v43  ;;  %vm583_vm6 = vmor %vm581_vm13, %vm582_vm2 }
 0x154   :  { %v557_v57 = vmul.f32 %v1688_v55, %v556_v15  ;;  %898 = vrsqrt.f32 %v1692_v22  ;;  %vm632_vm4 = vweird.f32 %v1694_v25  ;;  %v1722_v19 = vadd.f32 1e-05, %v330_v36  ;;  %vm563_vm8 = vmor %vm561_vm15, %vm562_vm3  ;;  %v300_v36 = vpop.xlane.xlu0 %299 }
 0x155   :  { %v600_v44 = vmul.f32 %v1664_v20, %v599_v50  ;;  %v579_v13 = vsub.f32 1.5, %v578_v51  ;;  %v627_v34 = vmul.f32 %v1694_v25, %v626_v27  ;;  %805 = vst [vmem:[#allocation7 + $0x80] sm:$0xff] %v773_v23  ;;  %v328_v33 = vmul.f32 0.0078125, %v292_v30  ;;  %vm1748_vm7 = vmor %vm631_vm0, %vm632_vm4 }
 0x156   :  { %v558_v37 = vmul.f32 0.5, %v557_v57  ;;  %vm611_vm5 = vweird.f32 %v1686_v63  ;;  %900 = vrsqrt.f32 %v1722_v19  ;;  %v326_v2 = vmul.f32 0.0078125, %v1662_v39 }
 0x157   :  { %v604_v61 = vsel %vm1709_vm1, %v1664_v20, %v600_v44  ;;  %v580_v56 = vmul.f32 %v1673_v58, %v579_v13  ;;  %v628_v41 = vmul.f32 0.5, %v627_v34  ;;  %v331_v4 = vmul.f32 0.0078125, %v298_v9 }
 0x158   :  { %v1729_v29 = vpop.eup %896  ;;  %v710_v35 = vmul.f32 %v604_v61, %v1226_v40  ;;  %v559_v62 = vsub.f32 1.5, %v558_v37  ;;  %vm591_vm9 = vweird.f32 %v1692_v22  ;;  %vm661_vm10 = vweird.f32 %v1722_v19 }
 0x159   :  { %v584_v20 = vsel %vm583_vm6, %v1673_v58, %v580_v56  ;;  %v629_v30 = vsub.f32 1.5, %v628_v41  ;;  %v606_v60 = vmul.f32 %v1729_v29, %v1686_v63  ;;  %v1752_v58 = vadd.f32 1e-05, %v328_v33 }
 0x15a   :  { %v899_v3 = vpop.eup %898  ;;  %v745_v40 = vmul.f32 %v1305_v49, %v710_v35  ;;  %v708_v10 = vmul.f32 %v584_v20, %v1229_v11  ;;  %v560_v32 = vmul.f32 %v1688_v55, %v559_v62  ;;  %vm612_vm11 = vweird.f32 %v1729_v29 }
 0x15b   :  { %v630_v5 = vmul.f32 %v1694_v25, %v629_v30  ;;  %v607_v11 = vmul.f32 %v1729_v29, %v606_v60  ;;  %v586_v42 = vmul.f32 %v899_v3, %v1692_v22  ;;  %902 = vrsqrt.f32 %v1752_v58  ;;  %vm613_vm14 = vmor %vm611_vm5, %vm612_vm11 }
 0x15c   :  { %v780_v12 = vadd.f32 %v1321_v45, %v745_v40  ;;  %v743_v48 = vmul.f32 %v1305_v49, %v708_v10  ;;  %v564_v53 = vsel %vm563_vm8, %v1688_v55, %v560_v32  ;;  %v901_v54 = vpop.eup %900  ;;  %v1774_v28 = vadd.f32 1e-05, %v326_v2 }
 0x15d   :  { %v706_v38 = vmul.f32 %v564_v53, %v1223_v18  ;;  %v634_v26 = vsel %vm1748_vm7, %v1694_v25, %v630_v5  ;;  %v608_v47 = vmul.f32 0.5, %v607_v11  ;;  %v587_v31 = vmul.f32 %v899_v3, %v586_v42 }
 0x15e   :  { %812 = vst [vmem:[#allocation7 + $0xb8] sm:$0xff] %v780_v12  ;;  %v778_v1 = vadd.f32 %v1321_v45, %v743_v48  ;;  %v713_v46 = vmul.f32 %v634_v26, %v1241_v52  ;;  %v656_v15 = vmul.f32 %v901_v54, %v1722_v19  ;;  %vm592_vm12 = vweird.f32 %v899_v3 }
 0x15f   :  { %v741_v55 = vmul.f32 %v1305_v49, %v706_v38  ;;  %v609_v43 = vsub.f32 1.5, %v608_v47  ;;  %v588_v18 = vmul.f32 0.5, %v587_v31  ;;  %vm662_vm13 = vweird.f32 %v901_v54  ;;  %vm593_vm15 = vmor %vm591_vm9, %vm592_vm12 }
 0x160   :  { %810 = vst [vmem:[#allocation7 + $0xa8] sm:$0xff] %v778_v1  ;;  %v748_v25 = vmul.f32 %v1305_v49, %v713_v46  ;;  %904 = vrsqrt.f32 %v1774_v28  ;;  %v657_v27 = vmul.f32 %v901_v54, %v656_v15  ;;  %v1787_v57 = vadd.f32 1e-05, %v331_v4  ;;  %vm1804_vm0 = vmor %vm661_vm10, %vm662_vm13 }
 0x161   :  { %v776_v52 = vadd.f32 %v1321_v45, %v741_v55  ;;  %v610_v50 = vmul.f32 %v1729_v29, %v609_v43  ;;  %v589_v51 = vsub.f32 1.5, %v588_v18  ;;  %v903_v23 = vpop.eup %902  ;;  %v329_v44 = vmul.f32 0.0078125, %v1719_v59 }
 0x162   :  { %v783_v6 = vadd.f32 %v1321_v45, %v748_v25  ;;  %v332_v13 = vmul.f32 0.0078125, %v300_v36  ;;  %v658_v33 = vmul.f32 0.5, %v657_v27  ;;  %v636_v9 = vmul.f32 %v903_v23, %v1752_v58 }
 0x163   :  { %808 = vst [vmem:[#allocation7 + $0x98] sm:$0xff] %v776_v52  ;;  %v614_v34 = vsel %vm613_vm14, %v1729_v29, %v610_v50  ;;  %v590_v37 = vmul.f32 %v899_v3, %v589_v51  ;;  %906 = vrsqrt.f32 %v1787_v57  ;;  %v1797_v41 = vadd.f32 1e-05, %v329_v44 }
 0x164   :  { %815 = vst [vmem:[#allocation7 + $0xd0] sm:$0xff] %v783_v6  ;;  %v711_v61 = vmul.f32 %v614_v34, %v1244_v14  ;;  %v659_v56 = vsub.f32 1.5, %v658_v33  ;;  %v637_v59 = vmul.f32 %v903_v23, %v636_v9  ;;  %v1808_v22 = vadd.f32 1e-05, %v332_v13 }
 0x165   :  { %v594_v63 = vsel %vm593_vm15, %v899_v3, %v590_v37  ;;  %vm641_vm1 = vweird.f32 %v1752_v58  ;;  %vm642_vm2 = vweird.f32 %v903_v23  ;;  %908 = vrsqrt.f32 %v1797_v41 }
 0x166   :  { %v905_v35 = vpop.eup %904  ;;  %v746_v29 = vmul.f32 %v1305_v49, %v711_v61  ;;  %v709_v62 = vmul.f32 %v594_v63, %v1238_v21  ;;  %v660_v2 = vmul.f32 %v901_v54, %v659_v56  ;;  %v638_v20 = vmul.f32 0.5, %v637_v59  ;;  %vm643_vm3 = vmor %vm641_vm1, %vm642_vm2  ;;  %v913_v56 = vld [vmem:[%s1853_s2] ss:$0 sm:$0xff] }
 0x167   :  { %v616_v30 = vmul.f32 %v905_v35, %v1774_v28  ;;  %910 = vrsqrt.f32 %v1808_v22  ;;  %vm622_vm4 = vweird.f32 %v905_v35  ;;  %vm621_vm5 = vweird.f32 %v1774_v28 }
 0x168   :  { %v781_v60 = vadd.f32 %v1321_v45, %v746_v29  ;;  %v744_v4 = vmul.f32 %v1305_v49, %v709_v62  ;;  %v664_v21 = vsel %vm1804_vm0, %v901_v54, %v660_v2  ;;  %v639_v19 = vsub.f32 1.5, %v638_v20  ;;  %vm623_vm6 = vmor %vm621_vm5, %vm622_vm4 }
 0x169   :  { %v617_v3 = vmul.f32 %v905_v35, %v616_v30  ;;  %v907_v40 = vpop.eup %906  ;;  %v716_v32 = vmul.f32 %v664_v21, %v1256_v0  ;;  %vm671_vm7 = vweird.f32 %v1787_v57  ;;  %vm651_vm12 = vweird.f32 %v1797_v41 }
 0x16a   :  { %813 = vst [vmem:[#allocation7 + $0xc0] sm:$0xff] %v781_v60  ;;  %v779_v10 = vadd.f32 %v1321_v45, %v744_v4  ;;  %v640_v39 = vmul.f32 %v903_v23, %v639_v19  ;;  %v666_v11 = vmul.f32 %v907_v40, %v1787_v57  ;;  %vm672_vm8 = vweird.f32 %v907_v40 }
 0x16b   :  { %v618_v5 = vmul.f32 0.5, %v617_v3  ;;  %v751_v42 = vmul.f32 %v1305_v49, %v716_v32  ;;  %v909_v38 = vpop.eup %908  ;;  %vm673_vm9 = vmor %vm671_vm7, %vm672_vm8  ;;  %vm681_vm14 = vweird.f32 %v1808_v22 }
 0x16c   :  { %811 = vst [vmem:[#allocation7 + $0xb0] sm:$0xff] %v779_v10  ;;  %v644_v12 = vsel %vm643_vm3, %v903_v23, %v640_v39  ;;  %v667_v53 = vmul.f32 %v907_v40, %v666_v11  ;;  %v646_v1 = vmul.f32 %v909_v38, %v1797_v41  ;;  %vm652_vm10 = vweird.f32 %v909_v38 }
 0x16d   :  { %v619_v48 = vsub.f32 1.5, %v618_v5  ;;  %v786_v26 = vadd.f32 %v1321_v45, %v751_v42  ;;  %v714_v0 = vmul.f32 %v644_v12, %v1259_v17  ;;  %v911_v47 = vpop.eup %910  ;;  %vm653_vm13 = vmor %vm651_vm12, %vm652_vm10 }
 0x16e   :  { %v668_v54 = vmul.f32 0.5, %v667_v53  ;;  %v676_v46 = vmul.f32 %v911_v47, %v1808_v22  ;;  %v647_v18 = vmul.f32 %v909_v38, %v646_v1  ;;  %vm682_vm11 = vweird.f32 %v911_v47 }
 0x16f   :  { %v620_v31 = vmul.f32 %v905_v35, %v619_v48  ;;  %818 = vst [vmem:[#allocation7 + $0xe8] sm:$0xff] %v786_v26  ;;  %v749_v58 = vmul.f32 %v1305_v49, %v714_v0  ;;  %vm683_vm15 = vmor %vm681_vm14, %vm682_vm11 }
 0x170   :  { %v669_v43 = vsub.f32 1.5, %v668_v54  ;;  %v677_v28 = vmul.f32 %v911_v47, %v676_v46  ;;  %v648_v25 = vmul.f32 0.5, %v647_v18 }
 0x171   :  { %v624_v55 = vsel %vm623_vm6, %v905_v35, %v620_v31  ;;  %v784_v17 = vadd.f32 %v1321_v45, %v749_v58 }
 0x172   :  { %v712_v15 = vmul.f32 %v624_v55, %v1253_v24  ;;  %v670_v36 = vmul.f32 %v907_v40, %v669_v43  ;;  %v678_v50 = vmul.f32 0.5, %v677_v28  ;;  %v649_v27 = vsub.f32 1.5, %v648_v25  ;;  %v912_v24 = vld [vmem:[#allocation5] ss:$0 sm:$0xff] }
 0x173   :  { %816 = vst [vmem:[#allocation7 + $0xd8] sm:$0xff] %v784_v17 }
 0x174   :  { %v747_v52 = vmul.f32 %v1305_v49, %v712_v15  ;;  %v674_v51 = vsel %vm673_vm9, %v907_v40, %v670_v36  ;;  %v679_v57 = vsub.f32 1.5, %v678_v50  ;;  %v650_v44 = vmul.f32 %v909_v38, %v649_v27 }
 0x175   :  { %v717_v6 = vmul.f32 %v674_v51, %v1271_v16 }
 0x176   :  { %v782_v23 = vadd.f32 %v1321_v45, %v747_v52  ;;  %v680_v34 = vmul.f32 %v911_v47, %v679_v57  ;;  %v654_v49 = vsel %vm653_vm13, %v909_v38, %v650_v44 }
 0x177   :  { %v752_v13 = vmul.f32 %v912_v24, %v717_v6  ;;  %v715_v33 = vmul.f32 %v654_v49, %v1268_v8 }
 0x178   :  { %814 = vst [vmem:[#allocation7 + $0xc8] sm:$0xff] %v782_v23  ;;  %v684_v9 = vsel %vm683_vm15, %v911_v47, %v680_v34 }
 0x179   :  { %v787_v37 = vadd.f32 %v1321_v45, %v752_v13  ;;  %v718_v16 = vmul.f32 %v684_v9, %v1278_v7  ;;  %v750_v61 = vmul.f32 %v912_v24, %v715_v33 }
 0x17b   :  { %819 = vst [vmem:[#allocation7 + $0xf0] sm:$0xff] %v787_v37  ;;  %v753_v63 = vmul.f32 %v912_v24, %v718_v16  ;;  %v785_v59 = vadd.f32 %v913_v56, %v750_v61 }
 0x17d   :  { %v788_v45 = vadd.f32 %v913_v56, %v753_v63  ;;  %817 = vst [vmem:[#allocation7 + $0xe0] sm:$0xff] %v785_v59 }
 0x17f   :  { %820 = vst [vmem:[#allocation7 + $0xf8] sm:$0xff] %v788_v45 }
 0x180   :  { %833 = dma.vmem_to_hbm [thread:$0]  %s826_s25, 4096, %s828_s28, [#allocation4], %s993_s20, %s993_s20, %s994_s21  }
 0x181   :  { %990 = dma.done.wait [#allocation4], 4096  }
 0x182   :  { %991 = vsyncadd [#allocation4], 4294963200 }
 0x183   :  { %838 = vsyncpa [#allocation3], 1 }
 0x184   :  { %839 = vsyncpa [#allocation6], 1 }
 0x185   :  { %840 = vsyncpa [#allocation4], 1 }

</bundles_post_ra>
